<compile_context>
chip_gen: v5e
topology: v5e:2x2
jax: 0.10.0
libtpu: 0.0.40
codegen_flags: <defaults>
</compile_context>

<pallas_src>
import jax
import jax.numpy as jnp
from jax.experimental import pallas as pl
from jax.experimental.pallas import tpu as pltpu

HIDDEN = 100       # fixed by the PyTorch module definition
HIDDEN_PAD = 128   # lane-dense padded hidden width (keep at 128; see review)
LANE = 128
SUBLANE = 8


def _round_up(x, m):
    return ((x + m - 1) // m) * m


def _mlp_kernel(x_ref, w1_ref, b1_ref, w2_ref, b2_ref, w3_ref, b3_ref, o_ref):
    wdt = w1_ref.dtype  # bf16 weights; f32 accumulation on the MXU
    # In-kernel cast of the f32 input tile (VPU, hidden under the DMA).
    x = x_ref[...].astype(wdt)
    # Layer 1: Linear + ReLU
    h1 = jnp.dot(x, w1_ref[...], preferred_element_type=jnp.float32)
    h1 = jnp.maximum(h1 + b1_ref[...], 0.0)
    # Layer 2: Linear + ReLU
    h2 = jnp.dot(h1.astype(wdt), w2_ref[...], preferred_element_type=jnp.float32)
    h2 = jnp.maximum(h2 + b2_ref[...], 0.0)
    # Layer 3: Linear (no activation), true output width
    out = jnp.dot(h2.astype(wdt), w3_ref[...], preferred_element_type=jnp.float32)
    o_ref[...] = (out + b3_ref[...]).astype(o_ref.dtype)


def _vmem_budget_bytes():
    """Generation-aware VMEM budget (leave headroom for Mosaic scratch)."""
    try:
        cap = pltpu.get_tpu_info().vmem_capacity_bytes
        return int(0.75 * cap)
    except Exception:
        return 48 * (1 << 20)   # safe even on v7x (64 MiB physical)


def _vmem_estimate(tb, input_size, output_size, weight_bytes):
    return (2 * tb * input_size * 4        # double-buffered f32 x tiles
            + 2 * tb * output_size * 4     # double-buffered f32 out tiles
            + 2 * weight_bytes             # weights/biases (assume double-buffered)
            + 2 * tb * HIDDEN_PAD * 4      # h1, h2 f32 intermediates
            + 2 * tb * HIDDEN_PAD * 2      # bf16 casts of h1, h2
            + (2 << 20))                   # compiler-internal scratch slack


def neural_network_forward(x, params, *, block_batch=None):
    """Forward pass of the 3-layer MLP as one batch-tiled Pallas TPU kernel.

    Args:
        x: (batch, input_size) float32.
        params: dict from init_params():
            w1 (in, 128) bf16,  b1 (1, 128) f32,
            w2 (128, 128) bf16, b2 (1, 128) f32,
            w3 (128, output_size) bf16, b3 (1, output_size) f32.
        block_batch: optional batch tile size override (multiple of 8).
    Returns:
        (batch, output_size) float32.
    """
    batch, input_size = x.shape
    output_size = params["w3"].shape[1]
    weight_bytes = sum(int(v.size) * v.dtype.itemsize for v in params.values())

    # ---- batch tile selection -------------------------------------------
    if block_batch is None:
        block_batch = 1024 if batch >= 4096 else 512
    tb = _round_up(min(block_batch, _round_up(max(batch, 1), SUBLANE)), SUBLANE)

    # v7x megacore: make sure both TensorCores get at least one grid step.
    if batch >= 16 and pl.cdiv(batch, tb) < 2:
        tb = max(SUBLANE, _round_up(-(-batch // 2), SUBLANE))

    # Shrink the tile until the estimated footprint fits the VMEM budget.
    # (For input_size large enough that even tb=8 does not fit, a K grid axis
    #  over input_size with an f32 accumulator would be the next step.)
    budget = _vmem_budget_bytes()
    est = _vmem_estimate(tb, input_size, output_size, weight_bytes)
    while est > budget and tb > SUBLANE:
        tb = max(SUBLANE, _round_up(tb // 2, SUBLANE))
        est = _vmem_estimate(tb, input_size, output_size, weight_bytes)

    vmem_limit = None
    if est > 8 * (1 << 20):   # v5e default scoped VMEM is only 16 MiB
        vmem_limit = int(min(budget, 2 * est))

    # NOTE: the six weight/bias specs use a constant index_map; if VMEM gets
    # tight on v7x they could additionally be single-buffered via
    # pipeline_mode=pl.Buffered(1).
    const2d = lambda i: (0, 0)

    out = pl.pallas_call(
        _mlp_kernel,
        out_shape=jax.ShapeDtypeStruct((batch, output_size), jnp.float32),
        grid=(pl.cdiv(batch, tb),),   # ragged last block: no batch padding
        in_specs=[
            pl.BlockSpec((tb, input_size), lambda i: (i, 0)),   # x tile (pipelined)
            pl.BlockSpec(params["w1"].shape, const2d),
            pl.BlockSpec(params["b1"].shape, const2d),
            pl.BlockSpec(params["w2"].shape, const2d),
            pl.BlockSpec(params["b2"].shape, const2d),
            pl.BlockSpec(params["w3"].shape, const2d),
            pl.BlockSpec(params["b3"].shape, const2d),
        ],
        out_specs=pl.BlockSpec((tb, output_size), lambda i: (i, 0)),  # true-width out
        compiler_params=pltpu.CompilerParams(
            dimension_semantics=("parallel",),   # megacore-shardable batch axis
            vmem_limit_bytes=vmem_limit,
        ),
    )(
        x,
        params["w1"], params["b1"],
        params["w2"], params["b2"],
        params["w3"], params["b3"],
    )
    return out


def init_params(key, input_size, output_size, param_dtype=jnp.bfloat16):
    """PyTorch-style (Kaiming-uniform-ish) init.

    Hidden width is zero-padded 100 -> 128 (lane-dense); the output layer is
    kept at its true width.  Padded rows/columns and padded bias entries are
    zero, so padded hidden units are exactly inert through ReLU and the next
    layer.  Weights are stored (in, out) in `param_dtype` (bf16); biases f32.
    """

    def linear_init(k, fan_in, fan_out, fan_in_pad, fan_out_pad):
        kw, kb = jax.random.split(k)
        bound = fan_in ** -0.5
        w = jax.random.uniform(kw, (fan_in, fan_out), jnp.float32, -bound, bound)
        b = jax.random.uniform(kb, (1, fan_out), jnp.float32, -bound, bound)
        w_pad = jnp.zeros((fan_in_pad, fan_out_pad), jnp.float32).at[:fan_in, :fan_out].set(w)
        b_pad = jnp.zeros((1, fan_out_pad), jnp.float32).at[:, :fan_out].set(b)
        return w_pad.astype(param_dtype), b_pad  # bias kept f32 (added in f32)

    k1, k2, k3 = jax.random.split(key, 3)
    w1, b1 = linear_init(k1, input_size, HIDDEN, input_size, HIDDEN_PAD)
    w2, b2 = linear_init(k2, HIDDEN, HIDDEN, HIDDEN_PAD, HIDDEN_PAD)
    w3, b3 = linear_init(k3, HIDDEN, output_size, HIDDEN_PAD, output_size)
    return {"w1": w1, "b1": b1, "w2": w2, "b2": b2, "w3": w3, "b3": b3}


def _reference(x, params):
    """Pure-JAX reference replicating the kernel's bf16-in / f32-accumulate math."""
    wdt = params["w1"].dtype
    f32 = jnp.float32
    h = x.astype(wdt).astype(f32) @ params["w1"].astype(f32) + params["b1"]
    h = jnp.maximum(h, 0.0)
    h = h.astype(wdt).astype(f32) @ params["w2"].astype(f32) + params["b2"]
    h = jnp.maximum(h, 0.0)
    out = h.astype(wdt).astype(f32) @ params["w3"].astype(f32) + params["b3"]
    return out


if __name__ == "__main__":
    batch = 2
    input_size = 32
    output_size = 8

    key = jax.random.PRNGKey(0)
    k_params, k_x = jax.random.split(key)

    params = init_params(k_params, input_size, output_size)
    x = jax.random.normal(k_x, (batch, input_size), jnp.float32)

    out = neural_network_forward(x, params)
    out = jax.block_until_ready(out)

    ref = _reference(x, params)
    assert out.shape == (batch, output_size)
    assert jnp.allclose(out, ref, atol=1e-3, rtol=1e-3), (
        f"max abs err = {float(jnp.max(jnp.abs(out - ref)))}"
    )

    print("KERNEL_OK")
</pallas_src>

<mosaic_0001>
module attributes {stable_mosaic.version = 11 : i64} {
  func.func @_mlp_kernel(%arg0: i32, %arg1: memref<8x32xf32, #tpu.memory_space<vmem>>, %arg2: memref<32x128xbf16, #tpu.memory_space<vmem>>, %arg3: memref<1x128xf32, #tpu.memory_space<vmem>>, %arg4: memref<128x128xbf16, #tpu.memory_space<vmem>>, %arg5: memref<1x128xf32, #tpu.memory_space<vmem>>, %arg6: memref<128x8xbf16, #tpu.memory_space<vmem>>, %arg7: memref<1x8xf32, #tpu.memory_space<vmem>>, %arg8: memref<8x8xf32, #tpu.memory_space<vmem>>) attributes {dimension_semantics = [#tpu.dimension_semantics<parallel>], iteration_bounds = array<i64: 1>, scalar_prefetch = 0 : i64, scratch_operands = 0 : i64, tpu.core_type = #tpu.core_type<tc>, window_params = [{transform_indices = @transform_0, window_bounds = array<i64: 8, 32>}, {pipeline_mode = #tpu.pipeline_mode<synchronous>, transform_indices = @transform_1, window_bounds = array<i64: 32, 128>}, {pipeline_mode = #tpu.pipeline_mode<synchronous>, transform_indices = @transform_2, window_bounds = array<i64: 1, 128>}, {pipeline_mode = #tpu.pipeline_mode<synchronous>, transform_indices = @transform_3, window_bounds = array<i64: 128, 128>}, {pipeline_mode = #tpu.pipeline_mode<synchronous>, transform_indices = @transform_4, window_bounds = array<i64: 1, 128>}, {pipeline_mode = #tpu.pipeline_mode<synchronous>, transform_indices = @transform_5, window_bounds = array<i64: 128, 8>}, {pipeline_mode = #tpu.pipeline_mode<synchronous>, transform_indices = @transform_6, window_bounds = array<i64: 1, 8>}, {transform_indices = @transform_7, window_bounds = array<i64: 8, 8>}]} {
    %c0 = arith.constant 0 : index
    %c0_0 = arith.constant 0 : index
    %0 = vector.load %arg1[%c0, %c0_0] : memref<8x32xf32, #tpu.memory_space<vmem>>, vector<8x32xf32>
    %1 = arith.truncf %0 : vector<8x32xf32> to vector<8x32xbf16>
    %c0_1 = arith.constant 0 : index
    %c0_2 = arith.constant 0 : index
    %2 = vector.load %arg2[%c0_1, %c0_2] : memref<32x128xbf16, #tpu.memory_space<vmem>>, vector<32x128xbf16>
    %cst = arith.constant dense<0.000000e+00> : vector<8x128xf32>
    %3 = tpu.matmul %1, %2, %cst {dimension_numbers = #tpu.dot_dimension_numbers<[1], [0], [0], [1], [0, 0, 1, 1], [], []>} : vector<8x32xbf16>, vector<32x128xbf16>, vector<8x128xf32> -> vector<8x128xf32>
    %c0_3 = arith.constant 0 : index
    %c0_4 = arith.constant 0 : index
    %4 = vector.load %arg3[%c0_3, %c0_4] : memref<1x128xf32, #tpu.memory_space<vmem>>, vector<1x128xf32>
    %5 = vector.broadcast %4 : vector<1x128xf32> to vector<8x128xf32>
    %6 = arith.addf %3, %5 : vector<8x128xf32>
    %cst_5 = arith.constant 0.000000e+00 : f32
    %7 = vector.broadcast %cst_5 : f32 to vector<8x128xf32>
    %8 = arith.maximumf %6, %7 : vector<8x128xf32>
    %9 = arith.truncf %8 : vector<8x128xf32> to vector<8x128xbf16>
    %c0_6 = arith.constant 0 : index
    %c0_7 = arith.constant 0 : index
    %10 = vector.load %arg4[%c0_6, %c0_7] : memref<128x128xbf16, #tpu.memory_space<vmem>>, vector<128x128xbf16>
    %cst_8 = arith.constant dense<0.000000e+00> : vector<8x128xf32>
    %11 = tpu.matmul %9, %10, %cst_8 {dimension_numbers = #tpu.dot_dimension_numbers<[1], [0], [0], [1], [0, 0, 1, 1], [], []>} : vector<8x128xbf16>, vector<128x128xbf16>, vector<8x128xf32> -> vector<8x128xf32>
    %c0_9 = arith.constant 0 : index
    %c0_10 = arith.constant 0 : index
    %12 = vector.load %arg5[%c0_9, %c0_10] : memref<1x128xf32, #tpu.memory_space<vmem>>, vector<1x128xf32>
    %13 = vector.broadcast %12 : vector<1x128xf32> to vector<8x128xf32>
    %14 = arith.addf %11, %13 : vector<8x128xf32>
    %cst_11 = arith.constant 0.000000e+00 : f32
    %15 = vector.broadcast %cst_11 : f32 to vector<8x128xf32>
    %16 = arith.maximumf %14, %15 : vector<8x128xf32>
    %17 = arith.truncf %16 : vector<8x128xf32> to vector<8x128xbf16>
    %c0_12 = arith.constant 0 : index
    %c0_13 = arith.constant 0 : index
    %18 = vector.load %arg6[%c0_12, %c0_13] : memref<128x8xbf16, #tpu.memory_space<vmem>>, vector<128x8xbf16>
    %cst_14 = arith.constant dense<0.000000e+00> : vector<8x8xf32>
    %19 = tpu.matmul %17, %18, %cst_14 {dimension_numbers = #tpu.dot_dimension_numbers<[1], [0], [0], [1], [0, 0, 1, 1], [], []>} : vector<8x128xbf16>, vector<128x8xbf16>, vector<8x8xf32> -> vector<8x8xf32>
    %c0_15 = arith.constant 0 : index
    %c0_16 = arith.constant 0 : index
    %20 = vector.load %arg7[%c0_15, %c0_16] : memref<1x8xf32, #tpu.memory_space<vmem>>, vector<1x8xf32>
    %21 = vector.broadcast %20 : vector<1x8xf32> to vector<8x8xf32>
    %22 = arith.addf %19, %21 : vector<8x8xf32>
    %c0_17 = arith.constant 0 : index
    %c0_18 = arith.constant 0 : index
    %23 = vector.load %arg8[%c0_17, %c0_18] : memref<8x8xf32, #tpu.memory_space<vmem>>, vector<8x8xf32>
    tpu.vector_store %arg8[%c0_17, %c0_18], %22 {strides = array<i32>} : memref<8x8xf32, #tpu.memory_space<vmem>>, vector<8x8xf32>,
    return
  }
  func.func @transform_0(%arg0: i32) -> (i32, i32) {
    %c0_i32 = arith.constant 0 : i32
    %c0_i32_0 = arith.constant 0 : i32
    return %arg0, %c0_i32 : i32, i32
  }
  func.func @transform_1(%arg0: i32) -> (i32, i32) {
    %c0_i32 = arith.constant 0 : i32
    %c0_i32_0 = arith.constant 0 : i32
    %c0_i32_1 = arith.constant 0 : i32
    return %c0_i32, %c0_i32_0 : i32, i32
  }
  func.func @transform_2(%arg0: i32) -> (i32, i32) {
    %c0_i32 = arith.constant 0 : i32
    %c0_i32_0 = arith.constant 0 : i32
    %c0_i32_1 = arith.constant 0 : i32
    return %c0_i32, %c0_i32_0 : i32, i32
  }
  func.func @transform_3(%arg0: i32) -> (i32, i32) {
    %c0_i32 = arith.constant 0 : i32
    %c0_i32_0 = arith.constant 0 : i32
    %c0_i32_1 = arith.constant 0 : i32
    return %c0_i32, %c0_i32_0 : i32, i32
  }
  func.func @transform_4(%arg0: i32) -> (i32, i32) {
    %c0_i32 = arith.constant 0 : i32
    %c0_i32_0 = arith.constant 0 : i32
    %c0_i32_1 = arith.constant 0 : i32
    return %c0_i32, %c0_i32_0 : i32, i32
  }
  func.func @transform_5(%arg0: i32) -> (i32, i32) {
    %c0_i32 = arith.constant 0 : i32
    %c0_i32_0 = arith.constant 0 : i32
    %c0_i32_1 = arith.constant 0 : i32
    return %c0_i32, %c0_i32_0 : i32, i32
  }
  func.func @transform_6(%arg0: i32) -> (i32, i32) {
    %c0_i32 = arith.constant 0 : i32
    %c0_i32_0 = arith.constant 0 : i32
    %c0_i32_1 = arith.constant 0 : i32
    return %c0_i32, %c0_i32_0 : i32, i32
  }
  func.func @transform_7(%arg0: i32) -> (i32, i32) {
    %c0_i32 = arith.constant 0 : i32
    %c0_i32_0 = arith.constant 0 : i32
    return %arg0, %c0_i32 : i32, i32
  }
}

</mosaic_0001>

<bundles_post_ra>
// kernel: tpu_custom_call.1
= control target key start
LH: loop header
LB: loop body
LE: loop exit
PB: predicated region body
PF: predicated region fallthrough
CT: control target
= control target key end

     0   :  { %12 = vsyncpa [#allocation3], 0  ;;  %s534_s0 = inlined_call_operand.vmem [shape: f32[2,32], index: 0, kind: input, shape index: {}]   ;;  %s535_s1 = inlined_call_operand.hbm [shape: bf16[32,128], index: 1, kind: input, shape index: {}]   ;;  %s536_s2 = inlined_call_operand.vmem [shape: f32[1,128], index: 2, kind: input, shape index: {}]   ;;  %s537_s3 = inlined_call_operand.vmem [shape: bf16[128,128], index: 3, kind: input, shape index: {}]   ;;  %s538_s4 = inlined_call_operand.vmem [shape: f32[1,128], index: 4, kind: input, shape index: {}]   ;;  %s539_s5 = inlined_call_operand.vmem [shape: bf16[128,8], index: 5, kind: input, shape index: {}]   ;;  %s540_s6 = inlined_call_operand.vmem [shape: f32[1,8], index: 6, kind: input, shape index: {}]   ;;  %s541_s7 = inlined_call_operand.hbm [shape: f32[2,8], index: 7, kind: output, shape index: {}]  }
   0x1   :  { %13 = vsyncpa [#allocation4], 0  ;;  %s20_s26 = sshll.u32 %s535_s1, 4  ;;  %s422_s27 = smov [#allocation2]   ;;  %s21_s26 = int_to_ptr.hbm [resolvable:$true] %s20_s26 }
   0x2   :  { %s22_s28 = sshll.u32 %s422_s27, 4  ;;  %s423_s29 = smov 64   ;;  %s23_s28 = int_to_ptr.vmem [resolvable:$true] %s22_s28 }
   0x3   :  { %s424_s30 = smov 4  }
   0x4   :  { %28 = dma.hbm_to_vmem [thread:$0]  %s21_s26, 256, %s23_s28, [#allocation3], %s423_s29, %s423_s29, %s424_s30  }
   0x5   :  { %418 = dma.done.wait [#allocation3], 256  }
   0x6   :  { %419 = vsyncadd [#allocation3], 4294967040  ;;  %v344_v0 = vld [vmem:[#allocation2 + $0x8] sm:$0xff]  ;;  %v352_v1 = vld [vmem:[%s537_s3 + $0x38] sm:$0xff]  ;;  %vm66_vm0 = vcmask 261120   ;;  %vm249_vm1 = vcmask 64512  }
   0x7   :  { %76 = vmatpush.bf16.msra.mxu0 %v344_v0  ;;  %v343_v2 = vld [vmem:[#allocation2] sm:$0xff]  ;;  %153 = vmatpush.bf16.msra.mxu1 %v352_v1  ;;  %v351_v4 = vld [vmem:[%s537_s3 + $0x30] sm:$0xff]  ;;  %v350_v6 = vld [vmem:[%s537_s3 + $0x28] sm:$0xff] }
   0x8   :  { %v44_v3 = vld [vmem:[%s534_s0] sm:$0xff]  ;;  %v348_v8 = vld [vmem:[%s537_s3 + $0x18] sm:$0xff]  ;;  %v347_v9 = vld [vmem:[%s537_s3 + $0x10] sm:$0xff] }
   0x9   :  { %v45_v5 = vpack.c.bf16 %v44_v3, %v44_v3  ;;  %v349_v7 = vld [vmem:[%s537_s3 + $0x20] sm:$0xff]  ;;  %v346_v10 = vld [vmem:[%s537_s3 + $0x8] sm:$0xff]  ;;  %v360_v12 = vld [vmem:[%s539_s5 + $0x38] sm:$0xff] }
   0xa   :  { %v345_v11 = vld [vmem:[%s537_s3] sm:$0xff]  ;;  %236 = vmatpush.bf16.msra.mxu2 %v360_v12  ;;  %v359_v13 = vld [vmem:[%s539_s5 + $0x30] sm:$0xff]  ;;  %v358_v14 = vld [vmem:[%s539_s5 + $0x28] sm:$0xff] }
   0xb   :  { %77 = vmatpush.bf16.msra.mxu0 %v343_v2  ;;  %154 = vmatpush.bf16.msra.mxu1 %v351_v4  ;;  %v357_v15 = vld [vmem:[%s539_s5 + $0x20] sm:$0xff]  ;;  %v356_v16 = vld [vmem:[%s539_s5 + $0x18] sm:$0xff]  ;;  %v355_v17 = vld [vmem:[%s539_s5 + $0x10] sm:$0xff] }
   0xc   :  { %v367_v18 = vld [vmem:[%s536_s2] ss:$0 sm:$0xff]  ;;  %v354_v24 = vld [vmem:[%s539_s5 + $0x8] sm:$0xff] }
   0xd   :  { %v353_v25 = vld [vmem:[%s539_s5] sm:$0xff] }
   0xe   :  { %278 = vmatmul.msk.bf16.vlgmr.msra.gmra.mxu0 %vm66_vm0, %v45_v5  ;;  %237 = vmatpush.bf16.msra.mxu2 %v359_v13  ;;  %v368_v26 = vld [vmem:[%s538_s4] ss:$0 sm:$0xff] }
   0xf   :  { %155 = vmatpush.bf16.msra.mxu1 %v350_v6  ;;  %v369_v32 = vld [vmem:[%s540_s6] ss:$0 sm:$0xff] }
  0x12   :  { %238 = vmatpush.bf16.msra.mxu2 %v358_v14 }
  0x13   :  { %156 = vmatpush.bf16.msra.mxu1 %v349_v7 }
  0x16   :  { %239 = vmatpush.bf16.msra.mxu2 %v357_v15 }
  0x17   :  { %157 = vmatpush.bf16.msra.mxu1 %v348_v8 }
  0x1a   :  { %240 = vmatpush.bf16.msra.mxu2 %v356_v16 }
  0x1b   :  { %158 = vmatpush.bf16.msra.mxu1 %v347_v9 }
  0x1e   :  { %241 = vmatpush.bf16.msra.mxu2 %v355_v17 }
  0x1f   :  { %159 = vmatpush.bf16.msra.mxu1 %v346_v10 }
  0x22   :  { %242 = vmatpush.bf16.msra.mxu2 %v354_v24 }
  0x23   :  { %160 = vmatpush.bf16.msra.mxu1 %v345_v11 }
  0x26   :  { %243 = vmatpush.bf16.msra.mxu2 %v353_v25 }
  0x8b   :  { %v79_v19 = vpop.f32.mrf.mxu0 }
  0x8c   :  { %v80_v20 = vadd.f32 %v367_v18, %v79_v19 }
  0x8e   :  { %v83_v21 = vmax.f32 %v80_v20, 0.0 }
  0x90   :  { %v84_v22 = vpack.c.bf16 %v83_v21, %v83_v21 }
  0x92   :  { %161 = vmatmul.bf16.vlgmr.msra.gmra.mxu1 %v84_v22 }
  0x93   :  { %v81_v23 = vpop.f32.mrf.mxu0 }
 0x10f   :  { %v162_v27 = vpop.f32.mrf.mxu1 }
 0x110   :  { %v163_v28 = vadd.f32 %v368_v26, %v162_v27 }
 0x112   :  { %v166_v29 = vmax.f32 %v163_v28, 0.0 }
 0x114   :  { %v167_v30 = vpack.c.bf16 %v166_v29, %v166_v29 }
 0x116   :  { %244 = vmatmul.bf16.vlgmr.msra.gmra.mxu2 %v167_v30 }
 0x117   :  { %v164_v31 = vpop.f32.mrf.mxu1 }
 0x199   :  { %v245_v33 = vpop.f32.mrf.mxu2 }
 0x19a   :  { %v246_v34 = vadd.f32 %v369_v32, %v245_v33 }
 0x19c   :  { %250 = vst.msk [vmem:[#allocation5] sm:$0xff] %vm249_vm1, %v246_v34 }
 0x1a1   :  { %v247_v35 = vpop.f32.mrf.mxu2 }
 0x1a2   :  { %254 = vsyncadd [#allocation4], 96  ;;  %s257_s4 = sshll.u32 %s541_s7, 4  ;;  %s425_s20 = smov [#allocation5]   ;;  %s258_s4 = int_to_ptr.hbm [resolvable:$true] %s257_s4 }
 0x1a3   :  { %s255_s21 = sshll.u32 %s425_s20, 4  ;;  %s426_s22 = smov 32   ;;  %s256_s21 = int_to_ptr.vmem [resolvable:$true] %s255_s21 }
 0x1a4   :  { %s427_s23 = smov 2  }
 0x1a5   :  { %263 = dma.vmem_to_hbm [thread:$0]  %s256_s21, 32, %s258_s4, [#allocation4], %s426_s22, %s426_s22, %s427_s23  }
 0x1a6   :  { %420 = dma.done.wait [#allocation4], 128  }
 0x1a7   :  { %421 = vsyncadd [#allocation4], 4294967168 }
 0x1a8   :  { %268 = vsyncpa [#allocation3], 1 }
 0x1a9   :  { %269 = vsyncpa [#allocation4], 1 }

</bundles_post_ra>
